<compile_context>
chip_gen: v5e
topology: v5e:2x2
jax: 0.10.0
libtpu: 0.0.40
codegen_flags: <defaults>
</compile_context>

<pallas_src>
import jax
import jax.numpy as jnp
from jax.experimental import pallas as pl
from jax.experimental.pallas import tpu as pltpu

HIDDEN = 512
LANE = 128           # lane width: pad output channels to a multiple of this
TB_MAX = 256         # max batch tile (fills v6e/v7x MXU rows)


def mangonet_kernel(x_ref, w1_ref, b1_ref, w2_ref, b2_ref, o_ref):
    # x_ref: (TB, Cin) bf16   w1_ref: (Cin, H) bf16   b1_ref: (1, H) f32
    # w2_ref: (H, Cout_p) bf16   b2_ref: (1, Cout_p) f32   o_ref: (TB, Cout_p) f32
    x = x_ref[...]
    h = jnp.dot(x, w1_ref[...], preferred_element_type=jnp.float32)
    h = jnp.maximum(h + b1_ref[...], 0.0)            # bias + ReLU in f32
    h = h.astype(jnp.bfloat16)                       # bf16 operand for 2nd matmul
    out = jnp.dot(h, w2_ref[...], preferred_element_type=jnp.float32)
    o_ref[...] = out + b2_ref[...]                   # f32 output, lane-dense store


def _round_up(n, m):
    return ((n + m - 1) // m) * m


def mangonet_forward(x, w1, b1, w2, b2):
    """x: (B, Cin) f32; w1: (Cin, 512); b1: (512,); w2: (512, Cout); b2: (Cout,)."""
    B, Cin = x.shape
    H = w1.shape[1]
    Cout = w2.shape[1]

    # --- lane-dense output padding -------------------------------------------------
    Cout_p = _round_up(Cout, LANE)
    w2_p = jnp.zeros((H, Cout_p), jnp.bfloat16).at[:, :Cout].set(w2.astype(jnp.bfloat16))
    b2_p = jnp.zeros((1, Cout_p), jnp.float32).at[:, :Cout].set(
        b2.reshape(1, Cout).astype(jnp.float32))

    # --- batch tiling (weights stay resident across grid steps) --------------------
    B_pad8 = _round_up(B, 8)                         # sublane multiple
    TB = B_pad8 if B_pad8 <= TB_MAX else TB_MAX
    B_p = _round_up(B, TB)
    x_bf16 = x.astype(jnp.bfloat16)
    if B_p != B:
        x_bf16 = jnp.zeros((B_p, Cin), jnp.bfloat16).at[:B, :].set(x_bf16)
    n_tiles = B_p // TB

    w1_bf16 = w1.astype(jnp.bfloat16)
    b1_2d = b1.reshape(1, H).astype(jnp.float32)

    cost = pl.CostEstimate(
        flops=2 * B_p * (Cin * H + H * Cout_p),
        transcendentals=0,
        bytes_accessed=(x_bf16.size * 2 + w1_bf16.size * 2 + w2_p.size * 2
                        + b1_2d.size * 4 + b2_p.size * 4 + B_p * Cout_p * 4),
    )

    out_p = pl.pallas_call(
        mangonet_kernel,
        out_shape=jax.ShapeDtypeStruct((B_p, Cout_p), jnp.float32),
        grid=(n_tiles,),
        in_specs=[
            pl.BlockSpec((TB, Cin), lambda i: (i, 0)),       # x tile follows grid
            pl.BlockSpec((Cin, H), lambda i: (0, 0)),        # weights resident
            pl.BlockSpec((1, H), lambda i: (0, 0)),
            pl.BlockSpec((H, Cout_p), lambda i: (0, 0)),
            pl.BlockSpec((1, Cout_p), lambda i: (0, 0)),
        ],
        out_specs=pl.BlockSpec((TB, Cout_p), lambda i: (i, 0)),
        compiler_params=pltpu.CompilerParams(
            dimension_semantics=("parallel",)),              # v7x: shard batch over 2 TCs
        cost_estimate=cost,
    )(x_bf16, w1_bf16, b1_2d, w2_p, b2_p)

    return out_p[:B, :Cout]


def init_params(key, input_channel, hidden, output_channel):
    # Deterministic init mimicking nn.Linear's kaiming-uniform fan-in bounds.
    k1, k2, k3, k4 = jax.random.split(key, 4)
    bound1 = 1.0 / jnp.sqrt(input_channel)
    bound2 = 1.0 / jnp.sqrt(hidden)
    # Stored already transposed to (in_features, out_features).
    w1 = jax.random.uniform(k1, (input_channel, hidden), jnp.float32, -bound1, bound1)
    b1 = jax.random.uniform(k2, (hidden,), jnp.float32, -bound1, bound1)
    w2 = jax.random.uniform(k3, (hidden, output_channel), jnp.float32, -bound2, bound2)
    b2 = jax.random.uniform(k4, (output_channel,), jnp.float32, -bound2, bound2)
    return w1, b1, w2, b2


if __name__ == "__main__":
    batch = 8
    input_channel = 32
    hidden = HIDDEN
    output_channel = 16

    key = jax.random.PRNGKey(0)
    kx, kp = jax.random.split(key)
    x = jax.random.normal(kx, (batch, input_channel), jnp.float32)
    w1, b1, w2, b2 = init_params(kp, input_channel, hidden, output_channel)

    out = mangonet_forward(x, w1, b1, w2, b2)
    out = jax.block_until_ready(out)

    # Pure-JAX f32 reference; tolerance loosened because operands are bf16
    # (accumulation is still f32).
    ref = jnp.maximum(x @ w1 + b1, 0.0) @ w2 + b2
    assert out.shape == (batch, output_channel)
    assert jnp.allclose(out, ref, atol=3e-2, rtol=3e-2), \
        f"max abs err {jnp.max(jnp.abs(out - ref))}"

    print("KERNEL_OK")
</pallas_src>

<mosaic_0001>
module attributes {stable_mosaic.version = 11 : i64} {
  func.func @mangonet_kernel(%arg0: i32, %arg1: memref<8x32xbf16, #tpu.memory_space<vmem>>, %arg2: memref<32x512xbf16, #tpu.memory_space<vmem>>, %arg3: memref<1x512xf32, #tpu.memory_space<vmem>>, %arg4: memref<512x128xbf16, #tpu.memory_space<vmem>>, %arg5: memref<1x128xf32, #tpu.memory_space<vmem>>, %arg6: memref<8x128xf32, #tpu.memory_space<vmem>>) attributes {dimension_semantics = [#tpu.dimension_semantics<parallel>], iteration_bounds = array<i64: 1>, scalar_prefetch = 0 : i64, scratch_operands = 0 : i64, tpu.core_type = #tpu.core_type<tc>, window_params = [{transform_indices = @transform_0, window_bounds = array<i64: 8, 32>}, {pipeline_mode = #tpu.pipeline_mode<synchronous>, transform_indices = @transform_1, window_bounds = array<i64: 32, 512>}, {pipeline_mode = #tpu.pipeline_mode<synchronous>, transform_indices = @transform_2, window_bounds = array<i64: 1, 512>}, {pipeline_mode = #tpu.pipeline_mode<synchronous>, transform_indices = @transform_3, window_bounds = array<i64: 512, 128>}, {pipeline_mode = #tpu.pipeline_mode<synchronous>, transform_indices = @transform_4, window_bounds = array<i64: 1, 128>}, {transform_indices = @transform_5, window_bounds = array<i64: 8, 128>}]} {
    %c0 = arith.constant 0 : index
    %c0_0 = arith.constant 0 : index
    %0 = vector.load %arg1[%c0, %c0_0] : memref<8x32xbf16, #tpu.memory_space<vmem>>, vector<8x32xbf16>
    %c0_1 = arith.constant 0 : index
    %c0_2 = arith.constant 0 : index
    %1 = vector.load %arg2[%c0_1, %c0_2] : memref<32x512xbf16, #tpu.memory_space<vmem>>, vector<32x512xbf16>
    %cst = arith.constant dense<0.000000e+00> : vector<8x512xf32>
    %2 = tpu.matmul %0, %1, %cst {dimension_numbers = #tpu.dot_dimension_numbers<[1], [0], [0], [1], [0, 0, 1, 1], [], []>} : vector<8x32xbf16>, vector<32x512xbf16>, vector<8x512xf32> -> vector<8x512xf32>
    %c0_3 = arith.constant 0 : index
    %c0_4 = arith.constant 0 : index
    %3 = vector.load %arg3[%c0_3, %c0_4] : memref<1x512xf32, #tpu.memory_space<vmem>>, vector<1x512xf32>
    %4 = vector.broadcast %3 : vector<1x512xf32> to vector<8x512xf32>
    %5 = arith.addf %2, %4 : vector<8x512xf32>
    %cst_5 = arith.constant 0.000000e+00 : f32
    %6 = vector.broadcast %cst_5 : f32 to vector<8x512xf32>
    %7 = arith.maximumf %5, %6 : vector<8x512xf32>
    %8 = arith.truncf %7 : vector<8x512xf32> to vector<8x512xbf16>
    %c0_6 = arith.constant 0 : index
    %c0_7 = arith.constant 0 : index
    %9 = vector.load %arg4[%c0_6, %c0_7] : memref<512x128xbf16, #tpu.memory_space<vmem>>, vector<512x128xbf16>
    %cst_8 = arith.constant dense<0.000000e+00> : vector<8x128xf32>
    %10 = tpu.matmul %8, %9, %cst_8 {dimension_numbers = #tpu.dot_dimension_numbers<[1], [0], [0], [1], [0, 0, 1, 1], [], []>} : vector<8x512xbf16>, vector<512x128xbf16>, vector<8x128xf32> -> vector<8x128xf32>
    %c0_9 = arith.constant 0 : index
    %c0_10 = arith.constant 0 : index
    %11 = vector.load %arg5[%c0_9, %c0_10] : memref<1x128xf32, #tpu.memory_space<vmem>>, vector<1x128xf32>
    %12 = vector.broadcast %11 : vector<1x128xf32> to vector<8x128xf32>
    %13 = arith.addf %10, %12 : vector<8x128xf32>
    %c0_11 = arith.constant 0 : index
    %c0_12 = arith.constant 0 : index
    %14 = vector.load %arg6[%c0_11, %c0_12] : memref<8x128xf32, #tpu.memory_space<vmem>>, vector<8x128xf32>
    tpu.vector_store %arg6[%c0_11, %c0_12], %13 {strides = array<i32>} : memref<8x128xf32, #tpu.memory_space<vmem>>, vector<8x128xf32>,
    return
  }
  func.func @transform_0(%arg0: i32) -> (i32, i32) {
    %c0_i32 = arith.constant 0 : i32
    %c0_i32_0 = arith.constant 0 : i32
    return %arg0, %c0_i32 : i32, i32
  }
  func.func @transform_1(%arg0: i32) -> (i32, i32) {
    %c0_i32 = arith.constant 0 : i32
    %c0_i32_0 = arith.constant 0 : i32
    %c0_i32_1 = arith.constant 0 : i32
    return %c0_i32, %c0_i32_0 : i32, i32
  }
  func.func @transform_2(%arg0: i32) -> (i32, i32) {
    %c0_i32 = arith.constant 0 : i32
    %c0_i32_0 = arith.constant 0 : i32
    %c0_i32_1 = arith.constant 0 : i32
    return %c0_i32, %c0_i32_0 : i32, i32
  }
  func.func @transform_3(%arg0: i32) -> (i32, i32) {
    %c0_i32 = arith.constant 0 : i32
    %c0_i32_0 = arith.constant 0 : i32
    %c0_i32_1 = arith.constant 0 : i32
    return %c0_i32, %c0_i32_0 : i32, i32
  }
  func.func @transform_4(%arg0: i32) -> (i32, i32) {
    %c0_i32 = arith.constant 0 : i32
    %c0_i32_0 = arith.constant 0 : i32
    %c0_i32_1 = arith.constant 0 : i32
    return %c0_i32, %c0_i32_0 : i32, i32
  }
  func.func @transform_5(%arg0: i32) -> (i32, i32) {
    %c0_i32 = arith.constant 0 : i32
    %c0_i32_0 = arith.constant 0 : i32
    return %arg0, %c0_i32 : i32, i32
  }
}

</mosaic_0001>

<bundles_post_ra>
// kernel: tpu_custom_call.1
= control target key start
LH: loop header
LB: loop body
LE: loop exit
PB: predicated region body
PF: predicated region fallthrough
CT: control target
= control target key end

     0   :  { %10 = vsyncpa [#allocation3], 0  ;;  %s935_s0 = inlined_call_operand.hbm [shape: bf16[8,32], index: 0, kind: input, shape index: {}]   ;;  %s936_s1 = inlined_call_operand.hbm [shape: bf16[32,512], index: 1, kind: input, shape index: {}]   ;;  %s937_s2 = inlined_call_operand.hbm [shape: f32[1,512], index: 2, kind: input, shape index: {}]   ;;  %s938_s3 = inlined_call_operand.hbm [shape: bf16[512,128], index: 3, kind: input, shape index: {}]   ;;  %s939_s4 = inlined_call_operand.vmem [shape: f32[1,128], index: 4, kind: input, shape index: {}]   ;;  %s940_s5 = inlined_call_operand.hbm [shape: f32[8,128], index: 5, kind: output, shape index: {}]  }
   0x1   :  { %11 = vsyncpa [#allocation6], 0 }
   0x2   :  { %12 = vsyncpa [#allocation9], 0  ;;  %s29_s20 = sshll.u32 %s936_s1, 4  ;;  %s30_s20 = int_to_ptr.hbm [resolvable:$true] %s29_s20 }
   0x3   :  { %13 = vsyncpa [#allocation4], 0  ;;  %s878_s21 = smov [#allocation5]   ;;  %s19_s25 = sshll.u32 %s935_s0, 4  ;;  %s20_s25 = int_to_ptr.hbm [resolvable:$true] %s19_s25 }
   0x4   :  { %s31_s22 = sshll.u32 %s878_s21, 4  ;;  %s879_s26 = smov 256   ;;  %s32_s22 = int_to_ptr.vmem [resolvable:$true] %s31_s22 }
   0x5   :  { %s880_s27 = smov 16   ;;  %s881_s28 = smov [#allocation2]  }
   0x6   :  { %37 = dma.hbm_to_vmem [thread:$0]  %s30_s20, 1024, %s32_s22, [#allocation6], %s879_s26, %s879_s26, %s880_s27  }
   0x7   :  { %s21_s29 = sshll.u32 %s881_s28, 4  ;;  %s43_s7 = sshll.u32 %s937_s2, 4  ;;  %s22_s29 = int_to_ptr.vmem [resolvable:$true] %s21_s29  ;;  %s44_s7 = int_to_ptr.hbm [resolvable:$true] %s43_s7 }
   0x8   :  { %24 = dma.hbm_to_vmem [thread:$0]  %s20_s25, 64, %s22_s29, [#allocation3]  }
   0x9   :  { %s53_s9 = sshll.u32 %s938_s3, 4  ;;  %s882_s10 = smov [#allocation7]   ;;  %s54_s9 = int_to_ptr.hbm [resolvable:$true] %s53_s9 }
   0xa   :  { %s45_s11 = sshll.u32 %s882_s10, 4  ;;  %s883_s0 = smov [#allocation8]   ;;  %s46_s11 = int_to_ptr.vmem [resolvable:$true] %s45_s11 }
   0xb   :  { %48 = dma.hbm_to_vmem [thread:$0]  %s44_s7, 64, %s46_s11, [#allocation6]  }
   0xc   :  { %s55_s12 = sshll.u32 %s883_s0, 4  ;;  %s884_s13 = smov 64   ;;  %s56_s12 = int_to_ptr.vmem [resolvable:$true] %s55_s12 }
   0xd   :  { %s885_s14 = smov 4  }
   0xe   :  { %61 = dma.hbm_to_vmem [thread:$0]  %s54_s9, 4096, %s56_s12, [#allocation9], %s884_s13, %s884_s13, %s885_s14  }
   0xf   :  { %870 = dma.done.wait [#allocation3], 64  }
  0x10   :  { %871 = vsyncadd [#allocation3], 4294967232 }
  0x11   :  { %872 = dma.done.wait [#allocation6], 1088  }
  0x12   :  { %873 = vsyncadd [#allocation6], 4294966208 }
  0x13   :  { %874 = dma.done.wait [#allocation9], 4096  }
  0x14   :  { %875 = vsyncadd [#allocation9], 4294963200  ;;  %v562_v0 = vld [vmem:[#allocation5 + $0x28] sm:$0xf]  ;;  %v707_v1 = vld [vmem:[#allocation5 + $0x34] sm:$0xf0] }
  0x15   :  { %v705_v2 = vld [vmem:[#allocation5 + $0x2c] sm:$0xf]  ;;  %v563_v3 = vor.u32 %v707_v1, %v562_v0  ;;  %v564_v4 = vld [vmem:[#allocation5 + $0x38] sm:$0xf0]  ;;  %v554_v5 = vld [vmem:[#allocation5 + $0x20] sm:$0xf] }
  0x16   :  { %v706_v6 = vld [vmem:[#allocation5 + $0x2c] sm:$0xf0]  ;;  %v567_v7 = vor.u32 %v705_v2, %v564_v4  ;;  %v704_v9 = vld [vmem:[#allocation5 + $0x24] sm:$0xf]  ;;  %v556_v10 = vld [vmem:[#allocation5 + $0x30] sm:$0xf0] }
  0x17   :  { %v555_v8 = vor.u32 %v706_v6, %v554_v5  ;;  %v546_v11 = vld [vmem:[#allocation5 + $0x8] sm:$0xf]  ;;  %176 = vmatpush.bf16.msra.mxu2 %v563_v3  ;;  %v559_v12 = vor.u32 %v704_v9, %v556_v10  ;;  %v703_v13 = vld [vmem:[#allocation5 + $0x14] sm:$0xf0]  ;;  %v701_v14 = vld [vmem:[#allocation5 + $0xc] sm:$0xf] }
  0x18   :  { %v548_v15 = vld [vmem:[#allocation5 + $0x18] sm:$0xf0]  ;;  %189 = vmatpush.bf16.msra.mxu3 %v567_v7  ;;  %v547_v16 = vor.u32 %v703_v13, %v546_v11  ;;  %v538_v18 = vld [vmem:[#allocation5] sm:$0xf]  ;;  %v702_v19 = vld [vmem:[#allocation5 + $0xc] sm:$0xf0] }
  0x19   :  { %150 = vmatpush.bf16.msra.mxu0 %v555_v8  ;;  %v551_v17 = vor.u32 %v701_v14, %v548_v15  ;;  %163 = vmatpush.bf16.msra.mxu1 %v559_v12  ;;  %v539_v20 = vor.u32 %v702_v19, %v538_v18  ;;  %v700_v21 = vld [vmem:[#allocation5 + $0x4] sm:$0xf]  ;;  %v540_v22 = vld [vmem:[#allocation5 + $0x10] sm:$0xf0]  ;;  %v715_v23 = vld [vmem:[#allocation8 + $0x38] sm:$0xff]  ;;  %vm140_vm0 = vcmask 261120  }
  0x1a   :  { %v543_v24 = vor.u32 %v700_v21, %v540_v22  ;;  %v723_v25 = vld [vmem:[#allocation8 + $0x78] sm:$0xff]  ;;  %v714_v28 = vld [vmem:[#allocation8 + $0x30] sm:$0xff]  ;;  %v713_v32 = vld [vmem:[#allocation8 + $0x28] sm:$0xff]  ;;  %s886_s15 = smov [#allocation10]   ;;  %s524_s19 = sshll.u32 %s940_s5, 4  ;;  %s525_s19 = int_to_ptr.hbm [resolvable:$true] %s524_s19 }
  0x1b   :  { %177 = vmatpush.bf16.msra.mxu2 %v547_v16  ;;  %v81_v26 = vld [vmem:[#allocation2] sm:$0xf]  ;;  %v722_v30 = vld [vmem:[#allocation8 + $0x70] sm:$0xff]  ;;  %v721_v34 = vld [vmem:[#allocation8 + $0x68] sm:$0xff]  ;;  %s522_s16 = sshll.u32 %s886_s15, 4  ;;  %s523_s16 = int_to_ptr.vmem [resolvable:$true] %s522_s16 }
  0x1c   :  { %190 = vmatpush.bf16.msra.mxu3 %v551_v17  ;;  %v731_v27 = vld [vmem:[#allocation8 + $0xb8] sm:$0xff]  ;;  %v730_v31 = vld [vmem:[#allocation8 + $0xb0] sm:$0xff]  ;;  %v729_v35 = vld [vmem:[#allocation8 + $0xa8] sm:$0xff] }
  0x1d   :  { %151 = vmatpush.bf16.msra.mxu0 %v539_v20  ;;  %164 = vmatpush.bf16.msra.mxu1 %v543_v24  ;;  %v739_v29 = vld [vmem:[#allocation8 + $0xf8] sm:$0xff]  ;;  %v738_v33 = vld [vmem:[#allocation8 + $0xf0] sm:$0xff]  ;;  %v712_v36 = vld [vmem:[#allocation8 + $0x20] sm:$0xff] }
  0x1e   :  { %570 = vmatmul.msk.bf16.vlgmr.msra.gmra.mxu2 %vm140_vm0, %v81_v26  ;;  %v737_v37 = vld [vmem:[#allocation8 + $0xe8] sm:$0xff]  ;;  %v720_v38 = vld [vmem:[#allocation8 + $0x60] sm:$0xff]  ;;  %v711_v40 = vld [vmem:[#allocation8 + $0x18] sm:$0xff] }
  0x1f   :  { %571 = vmatmul.msk.bf16.vlgmr.msra.gmra.mxu3 %vm140_vm0, %v81_v26  ;;  %490 = vmatpush.bf16.msrb.mxu2 %v731_v27  ;;  %v728_v39 = vld [vmem:[#allocation8 + $0xa0] sm:$0xff]  ;;  %v719_v42 = vld [vmem:[#allocation8 + $0x58] sm:$0xff]  ;;  %v710_v44 = vld [vmem:[#allocation8 + $0x10] sm:$0xff] }
  0x20   :  { %568 = vmatmul.msk.bf16.vlgmr.msra.gmra.mxu0 %vm140_vm0, %v81_v26  ;;  %569 = vmatmul.msk.bf16.vlgmr.msra.gmra.mxu1 %vm140_vm0, %v81_v26  ;;  %v736_v41 = vld [vmem:[#allocation8 + $0xe0] sm:$0xff]  ;;  %v727_v43 = vld [vmem:[#allocation8 + $0x98] sm:$0xff]  ;;  %v718_v46 = vld [vmem:[#allocation8 + $0x50] sm:$0xff] }
  0x21   :  { %464 = vmatpush.bf16.msrb.mxu0 %v715_v23  ;;  %477 = vmatpush.bf16.msrb.mxu1 %v723_v25  ;;  %v735_v45 = vld [vmem:[#allocation8 + $0xd8] sm:$0xff]  ;;  %v709_v47 = vld [vmem:[#allocation8 + $0x8] sm:$0xff]  ;;  %v726_v48 = vld [vmem:[#allocation8 + $0x90] sm:$0xff] }
  0x22   :  { %503 = vmatpush.bf16.msrb.mxu3 %v739_v29  ;;  %v734_v49 = vld [vmem:[#allocation8 + $0xd0] sm:$0xff]  ;;  %v717_v50 = vld [vmem:[#allocation8 + $0x48] sm:$0xff]  ;;  %v708_v51 = vld [vmem:[#allocation8] sm:$0xff] }
  0x23   :  { %491 = vmatpush.bf16.msrb.mxu2 %v730_v31  ;;  %v725_v52 = vld [vmem:[#allocation8 + $0x88] sm:$0xff]  ;;  %v716_v54 = vld [vmem:[#allocation8 + $0x40] sm:$0xff]  ;;  %v90_v57 = vld [vmem:[#allocation7] sm:$0xf] }
  0x24   :  { %v733_v53 = vld [vmem:[#allocation8 + $0xc8] sm:$0xff]  ;;  %v724_v55 = vld [vmem:[#allocation8 + $0x80] sm:$0xff]  ;;  %v92_v58 = vperm.slane %v90_v57, 0  ;;  %v93_v59 = vperm.slane %v90_v57, 1  ;;  %v94_v0 = vperm.slane %v90_v57, 2  ;;  %v95_v2 = vperm.slane %v90_v57, 3 }
  0x25   :  { %465 = vmatpush.bf16.msrb.mxu0 %v714_v28  ;;  %478 = vmatpush.bf16.msrb.mxu1 %v722_v30  ;;  %v732_v56 = vld [vmem:[#allocation8 + $0xc0] sm:$0xff]  ;;  %v749_v18 = vld [vmem:[%s939_s4] ss:$0 sm:$0xff] }
  0x26   :  { %504 = vmatpush.bf16.msrb.mxu3 %v738_v33 }
  0x27   :  { %492 = vmatpush.bf16.msrb.mxu2 %v729_v35 }
  0x29   :  { %466 = vmatpush.bf16.msrb.mxu0 %v713_v32  ;;  %479 = vmatpush.bf16.msrb.mxu1 %v721_v34 }
  0x2a   :  { %505 = vmatpush.bf16.msrb.mxu3 %v737_v37 }
  0x2b   :  { %493 = vmatpush.bf16.msrb.mxu2 %v728_v39 }
  0x2d   :  { %467 = vmatpush.bf16.msrb.mxu0 %v712_v36  ;;  %480 = vmatpush.bf16.msrb.mxu1 %v720_v38 }
  0x2e   :  { %506 = vmatpush.bf16.msrb.mxu3 %v736_v41 }
  0x2f   :  { %494 = vmatpush.bf16.msrb.mxu2 %v727_v43 }
  0x31   :  { %468 = vmatpush.bf16.msrb.mxu0 %v711_v40  ;;  %481 = vmatpush.bf16.msrb.mxu1 %v719_v42 }
  0x32   :  { %507 = vmatpush.bf16.msrb.mxu3 %v735_v45 }
  0x33   :  { %495 = vmatpush.bf16.msrb.mxu2 %v726_v48 }
  0x35   :  { %469 = vmatpush.bf16.msrb.mxu0 %v710_v44  ;;  %482 = vmatpush.bf16.msrb.mxu1 %v718_v46 }
  0x36   :  { %508 = vmatpush.bf16.msrb.mxu3 %v734_v49 }
  0x37   :  { %496 = vmatpush.bf16.msrb.mxu2 %v725_v52 }
  0x39   :  { %470 = vmatpush.bf16.msrb.mxu0 %v709_v47  ;;  %483 = vmatpush.bf16.msrb.mxu1 %v717_v50 }
  0x3a   :  { %509 = vmatpush.bf16.msrb.mxu3 %v733_v53 }
  0x3b   :  { %497 = vmatpush.bf16.msrb.mxu2 %v724_v55 }
  0x3d   :  { %471 = vmatpush.bf16.msrb.mxu0 %v708_v51  ;;  %484 = vmatpush.bf16.msrb.mxu1 %v716_v54 }
  0x3e   :  { %510 = vmatpush.bf16.msrb.mxu3 %v732_v56 }
  0x9d   :  { %v153_v60 = vpop.f32.mrf.mxu0  ;;  %v166_v62 = vpop.f32.mrf.mxu1 }
  0x9e   :  { %v154_v61 = vadd.f32 %v153_v60, %v92_v58  ;;  %v167_v63 = vadd.f32 %v166_v62, %v93_v59 }
  0xa0   :  { %v196_v1 = vmax.f32 %v154_v61, 0.0  ;;  %v197_v3 = vmax.f32 %v167_v63, 0.0 }
  0xa1   :  { %v179_v5 = vpop.f32.mrf.mxu2 }
  0xa2   :  { %v200_v4 = vpack.c.bf16 %v196_v1, %v196_v1  ;;  %v201_v6 = vpack.c.bf16 %v197_v3, %v197_v3  ;;  %v180_v7 = vadd.f32 %v179_v5, %v94_v0  ;;  %v192_v8 = vpop.f32.mrf.mxu3 }
  0xa3   :  { %v193_v9 = vadd.f32 %v192_v8, %v95_v2 }
  0xa4   :  { %472 = vmatmul.bf16.vlgmr.msrb.gmra.mxu0 %v200_v4  ;;  %v198_v10 = vmax.f32 %v180_v7, 0.0  ;;  %485 = vmatmul.bf16.vlgmr.msrb.gmra.mxu1 %v201_v6 }
  0xa5   :  { %v155_v11 = vpop.f32.mrf.mxu0  ;;  %v199_v12 = vmax.f32 %v193_v9, 0.0  ;;  %v168_v13 = vpop.f32.mrf.mxu1 }
  0xa6   :  { %v202_v14 = vpack.c.bf16 %v198_v10, %v198_v10 }
  0xa7   :  { %v203_v15 = vpack.c.bf16 %v199_v12, %v199_v12 }
  0xa8   :  { %498 = vmatmul.bf16.vlgmr.msrb.gmra.mxu2 %v202_v14 }
  0xa9   :  { %511 = vmatmul.bf16.vlgmr.msrb.gmra.mxu3 %v203_v15  ;;  %v181_v16 = vpop.f32.mrf.mxu2 }
  0xaa   :  { %v194_v17 = vpop.f32.mrf.mxu3 }
 0x121   :  { %v473_v19 = vpop.f32.mrf.mxu0  ;;  %v486_v20 = vpop.f32.mrf.mxu1 }
 0x122   :  { %v474_v21 = vadd.f32 %v749_v18, %v473_v19 }
 0x124   :  { %v487_v22 = vadd.f32 %v486_v20, %v474_v21 }
 0x129   :  { %v475_v23 = vpop.f32.mrf.mxu0  ;;  %v488_v24 = vpop.f32.mrf.mxu1 }
 0x12b   :  { %v499_v25 = vpop.f32.mrf.mxu2 }
 0x12c   :  { %v500_v26 = vadd.f32 %v499_v25, %v487_v22  ;;  %v512_v27 = vpop.f32.mrf.mxu3 }
 0x12e   :  { %v513_v28 = vadd.f32 %v512_v27, %v500_v26 }
 0x130   :  { %516 = vst [vmem:[#allocation10] sm:$0xff] %v513_v28 }
 0x131   :  { %527 = dma.vmem_to_hbm [thread:$0]  %s523_s16, 128, %s525_s19, [#allocation4]  }
 0x133   :  { %v501_v29 = vpop.f32.mrf.mxu2 }
 0x134   :  { %v514_v30 = vpop.f32.mrf.mxu3 }
 0x135   :  { %876 = dma.done.wait [#allocation4], 128  }
 0x136   :  { %877 = vsyncadd [#allocation4], 4294967168 }
 0x137   :  { %532 = vsyncpa [#allocation3], 1 }
 0x138   :  { %533 = vsyncpa [#allocation6], 1 }
 0x139   :  { %534 = vsyncpa [#allocation9], 1 }
 0x13a   :  { %535 = vsyncpa [#allocation4], 1 }

</bundles_post_ra>
